<compile_context>
chip_gen: v6e
topology: v6e:2x2x1
jax: 0.10.0
libtpu: 0.0.40
codegen_flags: <defaults>
</compile_context>

<pallas_src>
import functools

import numpy as np
import jax
import jax.numpy as jnp
from jax import lax
from jax.experimental import pallas as pl
from jax.experimental.pallas import tpu as pltpu


# ---------------------------------------------------------------------------
# Fused (bf16 matmul -> f32 acc, + shift [+ relu]) Pallas kernel
# ---------------------------------------------------------------------------
def _fused_matmul_kernel(w_ref, p_ref, b_ref, o_ref, *, relu):
    acc = jnp.dot(w_ref[...], p_ref[...], preferred_element_type=jnp.float32)
    acc = acc + b_ref[...]                      # (Cout, 1) f32 broadcasts over lanes
    if relu:
        acc = jnp.maximum(acc, 0.0)
    o_ref[...] = acc.astype(o_ref.dtype)


def _pick_tm(k, m):
    """Pixel-tile width: a multiple of 128 dividing m, sized so the
    double-buffered bf16 patch block stays <= ~24 MiB while keeping ~4 grid
    steps per layer (pipelining + megacore sharding on 2-TC parts)."""
    if m <= 2048:
        return m
    tm = min(4096, m // 4)                      # aim for ~4 grid steps
    tm = max(128, (tm // 128) * 128)
    budget = 12 * 1024 * 1024                   # per-buffer bf16 patch bytes (x2 buffers)
    while tm > 256 and 2 * k * tm > budget:
        tm //= 2
    while m % tm and tm > 128:
        tm //= 2
    if m % tm:
        tm = 128
    return tm


_MM_CACHE = {}


def _get_mm_fn(cout, k, m, relu, out_dtype):
    """Build (and cache) a pallas_call for a given problem shape."""
    key = (cout, k, m, relu, jnp.dtype(out_dtype).name)
    fn = _MM_CACHE.get(key)
    if fn is not None:
        return fn
    tm = _pick_tm(k, m)
    kernel = functools.partial(_fused_matmul_kernel, relu=relu)
    fn = pl.pallas_call(
        kernel,
        out_shape=jax.ShapeDtypeStruct((cout, m), out_dtype),
        grid_spec=pltpu.PrefetchScalarGridSpec(
            num_scalar_prefetch=0,
            grid=(m // tm,),
            in_specs=[
                pl.BlockSpec((cout, k), lambda i: (0, 0)),   # bf16 weights (resident)
                pl.BlockSpec((k, tm), lambda i: (0, i)),     # bf16 im2col patches
                pl.BlockSpec((cout, 1), lambda i: (0, 0)),   # f32 folded BN shift
            ],
            out_specs=pl.BlockSpec((cout, tm), lambda i: (0, i)),
        ),
        compiler_params=pltpu.CompilerParams(
            dimension_semantics=("parallel",),               # independent pixel tiles
            vmem_limit_bytes=64 * 1024 * 1024,
            # Let XLA fuse the im2col producer into the patches input DMA so the
            # 9x-amplified patch stream is never materialized in HBM.
            allow_input_fusion=[False, True, False],
        ),
    )
    _MM_CACHE[key] = fn
    return fn


def fused_matmul(w, patches, shift, relu, out_dtype=jnp.bfloat16):
    """out(Cout, M) = [relu]( w(Cout, K) @ patches(K, M) + shift )   (bf16 in, f32 acc)."""
    cout, k = w.shape
    m = patches.shape[1]
    kp = -(-k // 16) * 16        # pad contraction dim to bf16 sublane packing
    mp = -(-m // 128) * 128      # pad pixel dim to a lane multiple
    if kp != k:
        w = jnp.pad(w, ((0, 0), (0, kp - k)))
    if kp != k or mp != m:
        patches = jnp.pad(patches, ((0, kp - k), (0, mp - m)))
    fn = _get_mm_fn(int(cout), int(kp), int(mp), bool(relu), out_dtype)
    out = fn(w, patches, shift.reshape(cout, 1).astype(jnp.float32))
    if mp != m:
        out = out[:, :m]
    return out


# ---------------------------------------------------------------------------
# Layout plumbing (im2col, separable bilinear interpolation)
# ---------------------------------------------------------------------------
def _im2col(x, kh, kw, stride, padding, dilation):
    """x: (C, H, W) -> patches (C*kh*kw, H_out*W_out); channel-major, then (ky, kx)."""
    c, h, w = x.shape
    h_out = (h + 2 * padding - dilation * (kh - 1) - 1) // stride + 1
    w_out = (w + 2 * padding - dilation * (kw - 1) - 1) // stride + 1
    xp = jnp.pad(x, ((0, 0), (padding, padding), (padding, padding)))
    cols = []
    for ky in range(kh):
        for kx in range(kw):
            ys, xs = ky * dilation, kx * dilation
            sl = xp[:, ys: ys + (h_out - 1) * stride + 1: stride,
                       xs: xs + (w_out - 1) * stride + 1: stride]
            cols.append(sl.reshape(c, h_out * w_out))
    patches = jnp.stack(cols, axis=1).reshape(c * kh * kw, h_out * w_out)
    return patches, h_out, w_out


def conv_bn_act(x, cp, out_dtype=jnp.bfloat16):
    """x: (Cin, H, W) -> (Cout, H_out, W_out) via the fused Pallas kernel."""
    cout, cin, kh, kw = cp['w'].shape
    x = x.astype(jnp.bfloat16)
    patches, ho, wo = _im2col(x, kh, kw, cp['stride'], cp['padding'], cp['dilation'])
    wmat = cp['w'].astype(jnp.bfloat16).reshape(cout, cin * kh * kw)
    out = fused_matmul(wmat, patches, cp['shift'], cp['relu'], out_dtype)
    return out.reshape(cout, ho, wo)


def _interp_matrix(n_out, n_in):
    """Bilinear (align_corners=True) 1-D interpolation matrix (n_out, n_in)."""
    A = np.zeros((n_out, n_in), dtype=np.float32)
    if n_in == 1:
        A[:, 0] = 1.0
        return A
    for i in range(n_out):
        s = i * (n_in - 1) / (n_out - 1) if n_out > 1 else 0.0
        i0 = min(int(np.floor(s)), n_in - 1)
        i1 = min(i0 + 1, n_in - 1)
        f = s - i0
        A[i, i0] += 1.0 - f
        A[i, i1] += f
    return A


# ---------------------------------------------------------------------------
# Parameters (random init; BatchNorm folded into weights/shift, inference mode)
# ---------------------------------------------------------------------------
def _make_conv(key, cin, cout, ksize, stride=1, padding=0, dilation=1,
               add_bn=True, add_relu=True):
    kw_key, kg, kb, km, kv = jax.random.split(key, 5)
    fan_in = cin * ksize * ksize
    gain = 2.0 if add_relu else 1.0
    w = jax.random.normal(kw_key, (cout, cin, ksize, ksize), jnp.float32) * np.sqrt(gain / fan_in)
    if add_bn:
        gamma = 0.8 + 0.4 * jax.random.uniform(kg, (cout,), jnp.float32)
        beta = 0.05 * jax.random.normal(kb, (cout,), jnp.float32)
        mean = 0.05 * jax.random.normal(km, (cout,), jnp.float32)
        var = 0.8 + 0.4 * jax.random.uniform(kv, (cout,), jnp.float32)
        scale = gamma / jnp.sqrt(var + 1e-5)
        shift = beta - mean * scale
        w = w * scale[:, None, None, None]       # fold BN scale into conv weights
    else:
        shift = jnp.zeros((cout,), jnp.float32)
    return dict(w=w, shift=shift, stride=stride,
                padding=padding, dilation=dilation, relu=add_relu)


def init_feature_extraction(key):
    it = iter(jax.random.split(key, 80))
    p = {}
    p['conv0_x'] = [
        _make_conv(next(it), 3, 32, 3, stride=2, padding=1),
        _make_conv(next(it), 32, 32, 3, stride=1, padding=1),
        _make_conv(next(it), 32, 32, 3, stride=1, padding=1),
    ]
    c1 = []
    for _ in range(3):
        c1.append(_make_conv(next(it), 32, 32, 3, stride=1, padding=1))
        c1.append(_make_conv(next(it), 32, 32, 3, stride=1, padding=1, add_relu=False))
    p['conv1_x'] = c1
    c2 = [_make_conv(next(it), 32, 64, 3, stride=2, padding=1),
          _make_conv(next(it), 64, 64, 3, stride=1, padding=1, add_relu=False)]
    for _ in range(15):
        c2.append(_make_conv(next(it), 64, 64, 3, stride=1, padding=1))
        c2.append(_make_conv(next(it), 64, 64, 3, stride=1, padding=1, add_relu=False))
    p['conv2_x'] = c2
    c3 = [_make_conv(next(it), 64, 128, 3, stride=1, padding=2, dilation=2),
          _make_conv(next(it), 128, 128, 3, stride=1, padding=2, dilation=2, add_relu=False)]
    for _ in range(2):
        c3.append(_make_conv(next(it), 128, 128, 3, stride=1, padding=2, dilation=2))
        c3.append(_make_conv(next(it), 128, 128, 3, stride=1, padding=2, dilation=2, add_relu=False))
    p['conv3_x'] = c3
    c4 = []
    for _ in range(3):
        c4.append(_make_conv(next(it), 128, 128, 3, stride=1, padding=4, dilation=4))
        c4.append(_make_conv(next(it), 128, 128, 3, stride=1, padding=4, dilation=4, add_relu=False))
    p['conv4_x'] = c4
    p['branches'] = [_make_conv(next(it), 128, 32, 1) for _ in range(4)]
    p['fusion'] = [
        _make_conv(next(it), 320, 128, 3, stride=1, padding=1),
        _make_conv(next(it), 128, 32, 1, add_bn=False, add_relu=False),
    ]
    return p


# ---------------------------------------------------------------------------
# Forward pass (run the whole thing under a single jax.jit)
# ---------------------------------------------------------------------------
BRANCH_POOLS = (64, 32, 16, 8)


def feature_extraction_forward(params, x):
    """x: (1, 3, H, W) float32 -> (1, 32, H//4, W//4) float32."""
    assert x.shape[0] == 1, "only batch_size=1 is implemented"
    h = x[0].astype(jnp.bfloat16)

    for cp in params['conv0_x']:
        h = conv_bn_act(h, cp)
    for cp in params['conv1_x']:
        h = conv_bn_act(h, cp)
    conv2 = h
    for cp in params['conv2_x']:
        conv2 = conv_bn_act(conv2, cp)
    h3 = conv2
    for cp in params['conv3_x']:
        h3 = conv_bn_act(h3, cp)
    conv4 = h3
    for cp in params['conv4_x']:
        conv4 = conv_bn_act(conv4, cp)

    c, hc, wc = conv4.shape
    conv4_f32 = conv4.astype(jnp.float32)

    # SPP branches: reshape-mean pooling, tiny 1x1 conv in plain jnp, and
    # separable align_corners=True bilinear upsample (two small 1-D matmuls).
    branches = []
    for cp, psize in zip(params['branches'], BRANCH_POOLS):
        assert hc % psize == 0 and wc % psize == 0
        ho, wo = hc // psize, wc // psize
        pooled = conv4_f32.reshape(c, ho, psize, wo, psize).mean(axis=(2, 4))
        w1 = cp['w'].reshape(cp['w'].shape[0], c)                   # (32, 128), BN-folded
        br = jnp.einsum('oc,chw->ohw', w1, pooled) + cp['shift'][:, None, None]
        br = jnp.maximum(br, 0.0)
        Ah = jnp.asarray(_interp_matrix(hc, ho))
        Aw = jnp.asarray(_interp_matrix(wc, wo))
        up = jnp.einsum('Hh,ohw,Ww->oHW', Ah, br, Aw)
        branches.append(up.astype(jnp.bfloat16))

    cat = jnp.concatenate([conv2, conv4] + branches, axis=0)        # (320, hc, wc) bf16
    out = conv_bn_act(cat, params['fusion'][0])                     # 3x3, 320 -> 128
    out = conv_bn_act(out, params['fusion'][1], out_dtype=jnp.float32)  # 1x1, 128 -> 32
    return out[None].astype(jnp.float32)                            # (1, 32, hc, wc)


# ---------------------------------------------------------------------------
# Cheap building-block self-checks (small shapes; bf16 tolerances)
# ---------------------------------------------------------------------------
def _check_conv_blocks(key):
    k1, k2, k3 = jax.random.split(key, 3)
    x = jax.random.normal(k1, (8, 16, 16), jnp.float32)

    cp = _make_conv(k2, 8, 16, 3, stride=2, padding=1)
    got = conv_bn_act(x, cp).astype(jnp.float32)
    ref = lax.conv_general_dilated(x[None], cp['w'], (2, 2), ((1, 1), (1, 1)),
                                   dimension_numbers=('NCHW', 'OIHW', 'NCHW'))[0]
    ref = jnp.maximum(ref + cp['shift'][:, None, None], 0.0)
    rel = jnp.max(jnp.abs(got - ref)) / (jnp.max(jnp.abs(ref)) + 1e-6)
    assert float(rel) < 5e-2, f"strided conv mismatch: {float(rel)}"

    cp2 = _make_conv(k3, 8, 8, 3, stride=1, padding=2, dilation=2, add_relu=False)
    got2 = conv_bn_act(x, cp2).astype(jnp.float32)
    ref2 = lax.conv_general_dilated(x[None], cp2['w'], (1, 1), ((2, 2), (2, 2)),
                                    rhs_dilation=(2, 2),
                                    dimension_numbers=('NCHW', 'OIHW', 'NCHW'))[0]
    ref2 = ref2 + cp2['shift'][:, None, None]
    rel2 = jnp.max(jnp.abs(got2 - ref2)) / (jnp.max(jnp.abs(ref2)) + 1e-6)
    assert float(rel2) < 5e-2, f"dilated conv mismatch: {float(rel2)}"


def _bilinear_ref(y, hc, wc):
    """Independent gather-based align_corners=True bilinear reference. y: (C, hp, wp)."""
    c, hp, wp = y.shape

    def axis(n_out, n_in):
        if n_in == 1:
            z = jnp.zeros((n_out,), jnp.int32)
            return z, z, jnp.zeros((n_out,), jnp.float32)
        s = jnp.arange(n_out, dtype=jnp.float32) * (n_in - 1) / (n_out - 1)
        i0 = jnp.clip(jnp.floor(s).astype(jnp.int32), 0, n_in - 1)
        i1 = jnp.clip(i0 + 1, 0, n_in - 1)
        return i0, i1, s - i0.astype(jnp.float32)

    h0, h1, fh = axis(hc, hp)
    w0, w1, fw = axis(wc, wp)
    top = y[:, h0, :] * (1 - fh)[None, :, None] + y[:, h1, :] * fh[None, :, None]
    return top[:, :, w0] * (1 - fw)[None, None, :] + top[:, :, w1] * fw[None, None, :]


def _check_pool_upsample(key):
    hc, wc, p = 16, 16, 4
    x = jax.random.normal(key, (8, hc, wc), jnp.float32)
    pooled = x.reshape(8, hc // p, p, wc // p, p).mean(axis=(2, 4))
    Ah = jnp.asarray(_interp_matrix(hc, hc // p))
    Aw = jnp.asarray(_interp_matrix(wc, wc // p))
    up = jnp.einsum('Hh,chw,Ww->cHW', Ah, pooled, Aw)
    ref_up = _bilinear_ref(pooled, hc, wc)
    rel = jnp.max(jnp.abs(up - ref_up)) / (jnp.max(jnp.abs(ref_up)) + 1e-6)
    assert float(rel) < 1e-4, f"bilinear upsample mismatch: {float(rel)}"


# ---------------------------------------------------------------------------
if __name__ == "__main__":
    key = jax.random.PRNGKey(0)
    k_param, k_input, k_chk1, k_chk2 = jax.random.split(key, 4)

    # Verify the Pallas conv kernel and the SPP math against small references.
    _check_conv_blocks(k_chk1)
    _check_pool_upsample(k_chk2)

    params = init_feature_extraction(k_param)
    # 256x256 is the smallest spatial size consistent with the module's fixed
    # 64x64 AvgPool branch (conv4_x is input/4 and must be >= 64x64).
    x = jax.random.normal(k_input, (1, 3, 256, 256), jnp.float32)

    forward = jax.jit(functools.partial(feature_extraction_forward, params))
    out = jax.block_until_ready(forward(x))

    assert out.shape == (1, 32, 64, 64), out.shape
    assert bool(jnp.all(jnp.isfinite(out))), "non-finite output"
    print("KERNEL_OK")
</pallas_src>

<mosaic_0001>
module attributes {stable_mosaic.version = 11 : i64} {
  func.func @_fused_matmul_kernel(%arg0: i32, %arg1: memref<16x80xbf16, #tpu.memory_space<vmem>>, %arg2: memref<80x128xbf16, #tpu.memory_space<vmem>>, %arg3: memref<16x1xf32, #tpu.memory_space<vmem>>, %arg4: memref<16x128xbf16, #tpu.memory_space<vmem>>) attributes {dimension_semantics = [#tpu.dimension_semantics<parallel>], iteration_bounds = array<i64: 1>, scalar_prefetch = 0 : i64, scratch_operands = 0 : i64, tpu.core_type = #tpu.core_type<tc>, window_params = [{pipeline_mode = #tpu.pipeline_mode<synchronous>, transform_indices = @transform_0, window_bounds = array<i64: 16, 80>}, {transform_indices = @transform_1, window_bounds = array<i64: 80, 128>}, {pipeline_mode = #tpu.pipeline_mode<synchronous>, transform_indices = @transform_2, window_bounds = array<i64: 16, 1>}, {transform_indices = @transform_3, window_bounds = array<i64: 16, 128>}]} {
    %c0 = arith.constant 0 : index
    %c0_0 = arith.constant 0 : index
    %0 = vector.load %arg1[%c0, %c0_0] : memref<16x80xbf16, #tpu.memory_space<vmem>>, vector<16x80xbf16>
    %c0_1 = arith.constant 0 : index
    %c0_2 = arith.constant 0 : index
    %1 = vector.load %arg2[%c0_1, %c0_2] : memref<80x128xbf16, #tpu.memory_space<vmem>>, vector<80x128xbf16>
    %cst = arith.constant dense<0.000000e+00> : vector<16x128xf32>
    %2 = tpu.matmul %0, %1, %cst {dimension_numbers = #tpu.dot_dimension_numbers<[1], [0], [0], [1], [0, 0, 1, 1], [], []>} : vector<16x80xbf16>, vector<80x128xbf16>, vector<16x128xf32> -> vector<16x128xf32>
    %c0_3 = arith.constant 0 : index
    %c0_4 = arith.constant 0 : index
    %3 = vector.load %arg3[%c0_3, %c0_4] : memref<16x1xf32, #tpu.memory_space<vmem>>, vector<16x1xf32>
    %4 = vector.broadcast %3 : vector<16x1xf32> to vector<16x128xf32>
    %5 = arith.addf %2, %4 : vector<16x128xf32>
    %cst_5 = arith.constant 0.000000e+00 : f32
    %6 = vector.broadcast %cst_5 : f32 to vector<16x128xf32>
    %7 = arith.maximumf %5, %6 : vector<16x128xf32>
    %8 = arith.truncf %7 : vector<16x128xf32> to vector<16x128xbf16>
    %c0_6 = arith.constant 0 : index
    %c0_7 = arith.constant 0 : index
    %9 = vector.load %arg4[%c0_6, %c0_7] : memref<16x128xbf16, #tpu.memory_space<vmem>>, vector<16x128xbf16>
    tpu.vector_store %arg4[%c0_6, %c0_7], %8 {strides = array<i32>} : memref<16x128xbf16, #tpu.memory_space<vmem>>, vector<16x128xbf16>,
    return
  }
  func.func @transform_0(%arg0: i32) -> (i32, i32) {
    %c0_i32 = arith.constant 0 : i32
    %c0_i32_0 = arith.constant 0 : i32
    %c0_i32_1 = arith.constant 0 : i32
    return %c0_i32, %c0_i32_0 : i32, i32
  }
  func.func @transform_1(%arg0: i32) -> (i32, i32) {
    %c0_i32 = arith.constant 0 : i32
    %c0_i32_0 = arith.constant 0 : i32
    return %c0_i32, %arg0 : i32, i32
  }
  func.func @transform_2(%arg0: i32) -> (i32, i32) {
    %c0_i32 = arith.constant 0 : i32
    %c0_i32_0 = arith.constant 0 : i32
    %c0_i32_1 = arith.constant 0 : i32
    return %c0_i32, %c0_i32_0 : i32, i32
  }
  func.func @transform_3(%arg0: i32) -> (i32, i32) {
    %c0_i32 = arith.constant 0 : i32
    %c0_i32_0 = arith.constant 0 : i32
    return %c0_i32, %arg0 : i32, i32
  }
}

</mosaic_0001>

<bundles_post_ra>
// kernel: tpu_custom_call.1
= control target key start
LH: loop header
LB: loop body
LE: loop exit
PB: predicated region body
PF: predicated region fallthrough
CT: control target
= control target key end

     0   :  { %8 = vsyncpa [#allocation3], 0  ;;  %s305_s0 = inlined_call_operand.vmem [shape: bf16[16,80], index: 0, kind: input, shape index: {}]   ;;  %s306_s1 = inlined_call_operand.hbm [shape: bf16[80,128], index: 1, kind: input, shape index: {}]   ;;  %s307_s2 = inlined_call_operand.vmem [shape: f32[16,1], index: 2, kind: input, shape index: {}]   ;;  %s308_s3 = inlined_call_operand.hbm [shape: bf16[16,128], index: 3, kind: output, shape index: {}]  }
   0x1   :  { %9 = vsyncpa [#allocation4], 0  ;;  %s257_s12 = smov [#allocation2]  }
   0x2   :  { %s17_s13 = sshll.u32 %s257_s12, 4  ;;  %s18_s13 = int_to_ptr.vmem [resolvable:$true] %s17_s13 }
   0x3   :  { %s221_s14 = scalar_lea.vmem %s18_s13, 640  ;;  %p226_p1 = scmp.lt.s32.totalorder %s18_s13, %s18_s13 }
   0x4   :  { %p222_p0 = scmp.ne.s32.totalorder %s18_s13, %s221_s14  ;;  %p227_p2 = scmp.lt.s32.totalorder %s221_s14, %s221_s14 }
   0x6   :  { %p228_p3 = por %p227_p2, %p226_p1 }
   0x8   :  { %p229_p4 = pnand %p228_p3, %p222_p0 }
   0xa   :  { %232 = shalt.err (!%p229_p4)
}
   0xb   :  { %s258_s15 = smov 64   ;;  %s259_s16 = smov 4  }
   0xc   :  { %23 = dma.hbm_to_vmem [thread:$0]  %s306_s1, 640, %s18_s13, [#allocation3], %s258_s15, %s258_s15, %s259_s16  }
   0xd   :  { %253 = dma.done.wait [#allocation3], 640  }
   0xe   :  { %254 = vsyncadd [#allocation3], 4294966656  ;;  %v260_v0 = vmov 0.0   ;;  %vm261_vm0 = vmmov 0   ;;  %v262_v1 = vmov 0   ;;  %v207_v2 = vld [vmem:[#allocation2 + $0x20] sm:$0xff]  }
   0xf   :  { %185 = vmatprep.subr.bf16.mxu0 %v260_v0  ;;  %195 = vmatprep.mubr.msk.bf16.mxu0 %vm261_vm0, %v260_v0  ;;  %v208_v3 = vld [vmem:[#allocation2 + $0x18] sm:$0xff]   ;;  %v209_v4 = vld [vmem:[#allocation2 + $0x10] sm:$0xff]   ;;  %v42_v5 = vld [vmem:[%s307_s2] sm:$0xff]  ;;  %vm89_vm1 = vcmask 654336  }
  0x10   :  { %206 = vset.pattern.permute.xlu0 %v262_v1  ;;  %186 = vmatpush3.bf16.msra.mxu0 %v207_v2  ;;  %v43_v6 = vld [vmem:[%s307_s2 + $0x8] sm:$0xff]  ;;  %v211_v8 = vld [vmem:[#allocation2] sm:$0xff]   ;;  %s263_s2 = smov [#allocation5]  }
  0x11   :  { %187 = vmatprep.subr.bf16.mxu0 %v260_v0  ;;  %46 = vperm.xlu0 %206, %v42_v5   ;;  %v210_v7 = vld [vmem:[#allocation2 + $0x8] sm:$0xff]   ;;  %v212_v9 = vld [vmem:[%s305_s0] sm:$0xff]   ;;  %s151_s24 = sshll.u32 %s263_s2, 4  ;;  %s152_s24 = int_to_ptr.vmem [resolvable:$true] %s151_s24 }
  0x12   :  { %s233_s25 = scalar_lea.vmem %s152_s24, 128  ;;  %p238_p6 = scmp.lt.s32.totalorder %s152_s24, %s152_s24 }
  0x13   :  { %p234_p5 = scmp.ne.s32.totalorder %s152_s24, %s233_s25  ;;  %p239_p7 = scmp.lt.s32.totalorder %s233_s25, %s233_s25 }
  0x14   :  { %188 = vmatpush3.bf16.msra.mxu0 %v208_v3 }
  0x15   :  { %189 = vmatprep.subr.bf16.mxu0 %v260_v0  ;;  %51 = vperm.xlu0 %206, %v43_v6   ;;  %p240_p8 = por %p239_p7, %p238_p6 }
  0x17   :  { %p241_p9 = pnand %p240_p8, %p234_p5 }
  0x18   :  { %190 = vmatpush3.bf16.msra.mxu0 %v209_v4 }
  0x19   :  { %191 = vmatprep.subr.bf16.mxu0 %v260_v0 }
  0x1c   :  { %192 = vmatpush3.bf16.msra.mxu0 %v210_v7 }
  0x1d   :  { %193 = vmatprep.subr.bf16.mxu0 %v260_v0 }
  0x20   :  { %194 = vmatpush3.bf16.msra.mxu0 %v211_v8 }
  0x23   :  { %196 = vmatmul.mubr.msk.bf16.vlgmr.msra.gmra.mxu0 %vm89_vm1, %v212_v9 }
  0x8c   :  { %v47_v10 = vpop.permute.xlu0 %46 }
  0x90   :  { %v52_v14 = vpop.permute.xlu0 %51 }
  0xe3   :  { %v127_v11 = vpop.f32.mrf.mxu0 }
  0xe4   :  { %v128_v13 = vadd.f32 %v127_v11, %v47_v10 }
  0xe5   :  { %v197_v12 = vpop.f32.mrf.mxu0 }
  0xe6   :  { %v134_v18 = vmax.f32 %v128_v13, 0.0 }
  0xe7   :  { %v130_v15 = vpop.f32.mrf.mxu0 }
  0xe8   :  { %v131_v16 = vadd.f32 %v130_v15, %v52_v14 }
  0xe9   :  { %v198_v17 = vpop.f32.mrf.mxu0 }
  0xea   :  { %v135_v19 = vmax.f32 %v131_v16, 0.0 }
  0xec   :  { %v177_v20 = vpack.c.bf16 %v135_v19, %v134_v18 }
  0xee   :  { %178 = vst [vmem:[#allocation5] sm:$0xff] %v177_v20  }
  0xef   :  { %244 = shalt.err (!%p241_p9)
}
  0xf0   :  { %157 = dma.vmem_to_hbm [thread:$0]  %s152_s24, 128, %s308_s3, [#allocation4], %s258_s15, %s258_s15, %s259_s16  }
  0xf1   :  { %255 = dma.done.wait [#allocation4], 128  }
  0xf2   :  { %256 = vsyncadd [#allocation4], 4294967168 }
  0xf3   :  { %161 = vsyncpa [#allocation3], 1 }
  0xf4   :  { %162 = vsyncpa [#allocation4], 1 }

</bundles_post_ra>
